<compile_context>
chip_gen: v6e
topology: v6e:2x2x1
jax: 0.10.0
libtpu: 0.0.40
codegen_flags: <defaults>
</compile_context>

<pallas_src>
import jax
import jax.numpy as jnp
from jax.experimental import pallas as pl
from jax.experimental.pallas import tpu as pltpu


_TILE_ROWS = 8192  # 128-lane rows per block -> 4 MiB / f32 input block


def _num_tensorcores() -> int:
    """Best-effort TensorCores per chip (2 on v7x / megacore parts, else 1)."""
    try:
        info = pltpu.get_tpu_info()
        for name in ("num_tensorcores", "num_tensor_cores",
                     "tensorcores_per_chip", "tensor_cores_per_chip",
                     "num_cores_per_chip"):
            v = getattr(info, name, None)
            if v is not None:
                return max(1, min(int(v), 2))
    except Exception:
        pass
    try:
        kind = jax.devices()[0].device_kind.lower()
        if "lite" in kind or "v5e" in kind or "v6e" in kind:
            return 1
        if "v7" in kind or "v4" in kind or "v5p" in kind or "v5" in kind:
            return 2
    except Exception:
        pass
    return 1


def sgnet_rmse_loss(x_pred, x_true, *, tile_rows: int = _TILE_ROWS):
    """Pallas TPU implementation of sgnet_rmse_loss.forward.

    x_pred, x_true: (batch, enc_steps, dec_steps, pred_dim) arrays.
    Returns a float32 scalar: mean_{b,e} sum_d ||pred[b,e,d] - true[b,e,d]||_2.
    """
    assert x_pred.shape == x_true.shape
    B, E, D, P = x_pred.shape
    scale = 1.0 / float(B * E)

    if P > 128:
        # TODO(synk): pred_dim > 128 (a logical row spans several 128-lane
        # groups) is not implemented as a Pallas kernel; plain XLA fallback.
        d = x_pred.astype(jnp.float32) - x_true.astype(jnp.float32)
        return jnp.sum(jnp.sqrt(jnp.sum(d * d, axis=3))) * jnp.float32(scale)

    N = B * E * D
    # Pad pred_dim up to a power of two dividing 128 (unavoidable copy only
    # for non-power-of-two P); zero columns add 0 to every row's sum of squares.
    P_pad = int(pl.next_power_of_2(max(P, 1)))
    pred = x_pred.reshape(N, P)
    true = x_true.reshape(N, P)
    if P_pad != P:
        pred = jnp.pad(pred, ((0, 0), (0, P_pad - P)))
        true = jnp.pad(true, ((0, 0), (0, P_pad - P)))

    G = 128 // P_pad               # logical (b,e,d) rows per 128-lane row
    total = N * P_pad              # flattened element count
    r_valid = pl.cdiv(total, 128)  # 128-lane rows holding real data

    tile_rows = max(8, (int(tile_rows) // 8) * 8)
    ncores = _num_tensorcores()

    if r_valid <= tile_rows:
        # Single block covering the whole (row-padded) array: no masking needed.
        tile = max(8, ((r_valid + 7) // 8) * 8)
        steps, n_par, n_seq = 1, 1, 1
        r_store = tile
        need_mask = False
    else:
        # Multi-block: no tile-sized padding; the ragged tail block is masked
        # in-kernel (its VMEM contents beyond r_valid rows are stale).
        tile = tile_rows
        steps = pl.cdiv(r_valid, tile)
        n_par = 2 if (ncores >= 2 and steps >= 2) else 1
        n_seq = pl.cdiv(steps, n_par)
        r_store = r_valid
        need_mask = (steps * tile != r_valid) or (n_par * n_seq != steps)

    # Lane-dense (rows, 128) repack.  Only a tiny alignment pad remains; it
    # fuses with the reshape into a single pass (old version padded whole
    # tiles, up to MiBs of extra HBM read+write).
    flat_p = pred.reshape(-1)
    flat_t = true.reshape(-1)
    pad = r_store * 128 - total
    if pad:
        flat_p = jnp.pad(flat_p, (0, pad))
        flat_t = jnp.pad(flat_t, (0, pad))
    packed_p = flat_p.reshape(r_store, 128)
    packed_t = flat_t.reshape(r_store, 128)

    # (128, G) 0/1 selection matrix: lane i belongs to logical row i // P_pad.
    # 0/1 is exactly representable in bf16, so bf16 MXU passes against it only
    # carry the error of the lhs split.
    sel = (jnp.arange(128, dtype=jnp.int32)[:, None] // P_pad
           == jnp.arange(G, dtype=jnp.int32)[None, :]).astype(jnp.bfloat16)

    def kernel(pred_ref, true_ref, sel_ref, out_ref, acc_ref):
        k = pl.program_id(1)

        @pl.when(k == 0)
        def _init():
            acc_ref[...] = jnp.zeros_like(acc_ref)

        # Dense, lane-packed elementwise work (VPU).
        d = pred_ref[...].astype(jnp.float32) - true_ref[...].astype(jnp.float32)
        sq = d * d                                              # (tile, 128)

        if need_mask:
            # Zero rows past the end of the real data (stale VMEM in the
            # partial tail block / clamped duplicate block).  Select, not
            # multiply, so stale NaN/Inf cannot leak through.
            row0 = (pl.program_id(0) * n_seq + k) * tile
            rid = jax.lax.broadcasted_iota(jnp.int32, sq.shape, 0) + row0
            sq = jnp.where(rid < r_valid, sq, 0.0)

        # Per-logical-row sum over the P_pad adjacent lanes on the otherwise
        # idle MXU: manual hi/lo bf16 split + two DEFAULT-precision passes
        # (replaces the 6-pass precision=HIGHEST matmul; ~2^-18 rel. error).
        hi = sq.astype(jnp.bfloat16)
        lo = (sq - hi.astype(jnp.float32)).astype(jnp.bfloat16)
        sel_b = sel_ref[...]
        row_sq = (jnp.dot(hi, sel_b, preferred_element_type=jnp.float32)
                  + jnp.dot(lo, sel_b, preferred_element_type=jnp.float32))  # (tile, G)

        # sqrt on the EUP; reduce this step's rows with VPU adds straight into
        # the (1, G) accumulator — no per-step (tile, G) VMEM read-modify-write.
        acc_ref[...] += jnp.sum(jnp.sqrt(row_sq), axis=0, keepdims=True)

        @pl.when(k == pl.num_programs(1) - 1)
        def _finalize():
            tot = jnp.sum(acc_ref[...], axis=1, keepdims=True)   # lane reduce
            out_ref[...] = tot.reshape(1, 1, 1)

    if n_par * n_seq != steps:
        # Extra grid slots (odd block count split across 2 cores) re-read the
        # last real block; their logical rows are >= r_valid so the in-kernel
        # mask zeroes their contribution.
        last = steps - 1
        row_map = lambda p, k: (jnp.minimum(p * n_seq + k, last), 0)
    else:
        row_map = lambda p, k: (p * n_seq + k, 0)

    itemsize = x_pred.dtype.itemsize
    lanes = r_store * 128
    cost = pl.CostEstimate(
        flops=int(4 * lanes * G + 8 * lanes),
        transcendentals=int(r_store * G),
        bytes_accessed=int(2 * lanes * itemsize + 256 * G + n_par * 4),
    )

    # 2 inputs x 2 pipeline buffers + slack; capped well under v7x's 64 MiB.
    vmem_limit = max(32 << 20, min(4 * tile * 128 * itemsize + (4 << 20), 56 << 20))

    out = pl.pallas_call(
        kernel,
        out_shape=jax.ShapeDtypeStruct((n_par, 1, 1), jnp.float32),
        grid_spec=pltpu.PrefetchScalarGridSpec(
            num_scalar_prefetch=0,
            grid=(n_par, n_seq),
            in_specs=[
                pl.BlockSpec((tile, 128), row_map),
                pl.BlockSpec((tile, 128), row_map),
                pl.BlockSpec((128, G), lambda p, k: (0, 0)),
            ],
            out_specs=pl.BlockSpec((1, 1, 1), lambda p, k: (p, 0, 0)),
            scratch_shapes=[pltpu.VMEM((1, G), jnp.float32)],
        ),
        compiler_params=pltpu.CompilerParams(
            dimension_semantics=("parallel", "arbitrary"),
            vmem_limit_bytes=int(vmem_limit),
        ),
        cost_estimate=cost,
    )(packed_p, packed_t, sel)

    # Sum the per-core partials and apply the mean over (batch, enc_steps).
    return jnp.sum(out) * jnp.float32(scale)


def _reference(x_pred, x_true):
    d = x_pred.astype(jnp.float32) - x_true.astype(jnp.float32)
    l2_diff = jnp.sqrt(jnp.sum(d * d, axis=3))
    l2_all = jnp.sum(l2_diff, axis=2)
    return jnp.mean(jnp.mean(l2_all, axis=1), axis=0)


if __name__ == "__main__":
    key = jax.random.PRNGKey(0)
    k1, k2, k3, k4 = jax.random.split(key, 4)

    # Primary check: (batch, enc_steps, dec_steps, pred_dim) as in the module.
    B, E, D, P = 2, 8, 8, 4
    x_pred = jax.random.normal(k1, (B, E, D, P), dtype=jnp.float32)
    x_true = jax.random.normal(k2, (B, E, D, P), dtype=jnp.float32)
    out = jax.block_until_ready(sgnet_rmse_loss(x_pred, x_true))
    ref = _reference(x_pred, x_true)
    assert jnp.allclose(out, ref, rtol=1e-5, atol=1e-5), (out, ref)

    # Secondary check: non-power-of-two pred_dim + multi-block grid with an
    # in-kernel masked ragged tail (small tile_rows override keeps it tiny).
    B2, E2, D2, P2 = 3, 12, 8, 3
    y_pred = jax.random.normal(k3, (B2, E2, D2, P2), dtype=jnp.float32)
    y_true = jax.random.normal(k4, (B2, E2, D2, P2), dtype=jnp.float32)
    out2 = jax.block_until_ready(sgnet_rmse_loss(y_pred, y_true, tile_rows=8))
    ref2 = _reference(y_pred, y_true)
    assert jnp.allclose(out2, ref2, rtol=1e-5, atol=1e-5), (out2, ref2)

    print("KERNEL_OK")
</pallas_src>

<mosaic_0001>
module attributes {stable_mosaic.version = 11 : i64} {
  func.func @kernel(%arg0: i32, %arg1: i32, %arg2: memref<8x128xf32, #tpu.memory_space<vmem>>, %arg3: memref<8x128xf32, #tpu.memory_space<vmem>>, %arg4: memref<128x32xbf16, #tpu.memory_space<vmem>>, %arg5: memref<1x1x1xf32, #tpu.memory_space<vmem>>, %arg6: memref<1x32xf32, #tpu.memory_space<vmem>>) attributes {dimension_semantics = [#tpu.dimension_semantics<parallel>, #tpu.dimension_semantics<arbitrary>], iteration_bounds = array<i64: 1, 1>, scalar_prefetch = 0 : i64, scratch_operands = 1 : i64, tpu.core_type = #tpu.core_type<tc>, window_params = [{transform_indices = @transform_0, window_bounds = array<i64: 8, 128>}, {transform_indices = @transform_1, window_bounds = array<i64: 8, 128>}, {pipeline_mode = #tpu.pipeline_mode<synchronous>, transform_indices = @transform_2, window_bounds = array<i64: 128, 32>}, {transform_indices = @transform_3, window_bounds = array<i64: 1, 1, 1>}]} {
    %c0_i32 = arith.constant 0 : i32
    %0 = arith.cmpi eq, %arg1, %c0_i32 : i32
    %1 = arith.extui %0 : i1 to i32
    %c0_i32_0 = arith.constant 0 : i32
    %2 = arith.cmpi ne, %1, %c0_i32_0 : i32
    scf.if %2 {
      %cst_14 = arith.constant 0.000000e+00 : f32
      %24 = vector.broadcast %cst_14 : f32 to vector<1x32xf32>
      %c0_15 = arith.constant 0 : index
      %c0_16 = arith.constant 0 : index
      %25 = vector.load %arg6[%c0_15, %c0_16] : memref<1x32xf32, #tpu.memory_space<vmem>>, vector<1x32xf32>
      tpu.vector_store %arg6[%c0_15, %c0_16], %24 {strides = array<i32>} : memref<1x32xf32, #tpu.memory_space<vmem>>, vector<1x32xf32>,
    } else {
    }
    %c0 = arith.constant 0 : index
    %c0_1 = arith.constant 0 : index
    %3 = vector.load %arg2[%c0, %c0_1] : memref<8x128xf32, #tpu.memory_space<vmem>>, vector<8x128xf32>
    %c0_2 = arith.constant 0 : index
    %c0_3 = arith.constant 0 : index
    %4 = vector.load %arg3[%c0_2, %c0_3] : memref<8x128xf32, #tpu.memory_space<vmem>>, vector<8x128xf32>
    %5 = arith.subf %3, %4 : vector<8x128xf32>
    %6 = arith.mulf %5, %5 : vector<8x128xf32>
    %7 = arith.truncf %6 : vector<8x128xf32> to vector<8x128xbf16>
    %8 = arith.extf %7 : vector<8x128xbf16> to vector<8x128xf32>
    %9 = arith.subf %6, %8 : vector<8x128xf32>
    %10 = arith.truncf %9 : vector<8x128xf32> to vector<8x128xbf16>
    %c0_4 = arith.constant 0 : index
    %c0_5 = arith.constant 0 : index
    %11 = vector.load %arg4[%c0_4, %c0_5] : memref<128x32xbf16, #tpu.memory_space<vmem>>, vector<128x32xbf16>
    %cst = arith.constant dense<0.000000e+00> : vector<8x32xf32>
    %12 = tpu.matmul %7, %11, %cst {dimension_numbers = #tpu.dot_dimension_numbers<[1], [0], [0], [1], [0, 0, 1, 1], [], []>} : vector<8x128xbf16>, vector<128x32xbf16>, vector<8x32xf32> -> vector<8x32xf32>
    %cst_6 = arith.constant dense<0.000000e+00> : vector<8x32xf32>
    %13 = tpu.matmul %10, %11, %cst_6 {dimension_numbers = #tpu.dot_dimension_numbers<[1], [0], [0], [1], [0, 0, 1, 1], [], []>} : vector<8x128xbf16>, vector<128x32xbf16>, vector<8x32xf32> -> vector<8x32xf32>
    %14 = arith.addf %12, %13 : vector<8x32xf32>
    %c0_7 = arith.constant 0 : index
    %c0_8 = arith.constant 0 : index
    %15 = vector.load %arg6[%c0_7, %c0_8] : memref<1x32xf32, #tpu.memory_space<vmem>>, vector<1x32xf32>
    %16 = math.sqrt %14 : vector<8x32xf32>
    %cst_9 = arith.constant dense<0.000000e+00> : vector<32xf32>
    %17 = vector.multi_reduction <add>, %16, %cst_9 [0] : vector<8x32xf32> to vector<32xf32>
    %18 = vector.shape_cast %17 : vector<32xf32> to vector<1x32xf32>
    %19 = arith.addf %15, %18 : vector<1x32xf32>
    %c0_10 = arith.constant 0 : index
    %c0_11 = arith.constant 0 : index
    %20 = vector.load %arg6[%c0_10, %c0_11] : memref<1x32xf32, #tpu.memory_space<vmem>>, vector<1x32xf32>
    tpu.vector_store %arg6[%c0_10, %c0_11], %19 {strides = array<i32>} : memref<1x32xf32, #tpu.memory_space<vmem>>, vector<1x32xf32>,
    %c0_i32_12 = arith.constant 0 : i32
    %21 = arith.cmpi eq, %arg1, %c0_i32_12 : i32
    %22 = arith.extui %21 : i1 to i32
    %c0_i32_13 = arith.constant 0 : i32
    %23 = arith.cmpi ne, %22, %c0_i32_13 : i32
    scf.if %23 {
      %c0_14 = arith.constant 0 : index
      %c0_15 = arith.constant 0 : index
      %24 = vector.load %arg6[%c0_14, %c0_15] : memref<1x32xf32, #tpu.memory_space<vmem>>, vector<1x32xf32>
      %cst_16 = arith.constant dense<0.000000e+00> : vector<1xf32>
      %25 = vector.multi_reduction <add>, %24, %cst_16 [1] : vector<1x32xf32> to vector<1xf32>
      %26 = vector.shape_cast %25 : vector<1xf32> to vector<1x1xf32>
      %27 = vector.shape_cast %26 : vector<1x1xf32> to vector<1x1x1xf32>
      %c0_17 = arith.constant 0 : index
      %c0_18 = arith.constant 0 : index
      %c0_19 = arith.constant 0 : index
      %28 = vector.load %arg5[%c0_17, %c0_18, %c0_19] : memref<1x1x1xf32, #tpu.memory_space<vmem>>, vector<1x1x1xf32>
      tpu.vector_store %arg5[%c0_17, %c0_18, %c0_19], %27 {strides = array<i32>} : memref<1x1x1xf32, #tpu.memory_space<vmem>>, vector<1x1x1xf32>,
    } else {
    }
    return
  }
  func.func @transform_0(%arg0: i32, %arg1: i32) -> (i32, i32) {
    %c1_i32 = arith.constant 1 : i32
    %0 = arith.muli %arg0, %c1_i32 : i32
    %1 = arith.addi %0, %arg1 : i32
    %c0_i32 = arith.constant 0 : i32
    %c0_i32_0 = arith.constant 0 : i32
    return %1, %c0_i32 : i32, i32
  }
  func.func @transform_1(%arg0: i32, %arg1: i32) -> (i32, i32) {
    %c1_i32 = arith.constant 1 : i32
    %0 = arith.muli %arg0, %c1_i32 : i32
    %1 = arith.addi %0, %arg1 : i32
    %c0_i32 = arith.constant 0 : i32
    %c0_i32_0 = arith.constant 0 : i32
    return %1, %c0_i32 : i32, i32
  }
  func.func @transform_2(%arg0: i32, %arg1: i32) -> (i32, i32) {
    %c0_i32 = arith.constant 0 : i32
    %c0_i32_0 = arith.constant 0 : i32
    %c0_i32_1 = arith.constant 0 : i32
    return %c0_i32, %c0_i32_0 : i32, i32
  }
  func.func @transform_3(%arg0: i32, %arg1: i32) -> (i32, i32, i32) {
    %c0_i32 = arith.constant 0 : i32
    %c0_i32_0 = arith.constant 0 : i32
    %c0_i32_1 = arith.constant 0 : i32
    return %arg0, %c0_i32, %c0_i32_0 : i32, i32, i32
  }
}

</mosaic_0001>

<bundles_post_ra>
// kernel: tpu_custom_call.1
= control target key start
LH: loop header
LB: loop body
LE: loop exit
PB: predicated region body
PF: predicated region fallthrough
CT: control target
= control target key end

     0   :  { %v363_v1 = vmov 0.0   ;;  %vm364_vm0 = vmmov 0   ;;  %s422_s0 = inlined_call_operand.vmem [shape: f32[8,128], index: 0, kind: input, shape index: {}]   ;;  %s423_s1 = inlined_call_operand.vmem [shape: f32[8,128], index: 1, kind: input, shape index: {}]   ;;  %s424_s2 = inlined_call_operand.vmem [shape: bf16[128,32], index: 2, kind: input, shape index: {}]   ;;  %s425_s3 = inlined_call_operand.hbm [shape: f32[1,1,1], index: 3, kind: output, shape index: {}]  }
   0x1   :  { %v331_v0 = vld [vmem:[%s424_s2 + $0x38] sm:$0xff]   ;;  %288 = vmatprep.subr.bf16.mxu0 %v363_v1  ;;  %308 = vmatprep.subr.bf16.mxu1 %v363_v1  ;;  %v332_v2 = vld [vmem:[%s424_s2 + $0x30] sm:$0xff]   ;;  %v333_v3 = vld [vmem:[%s424_s2 + $0x28] sm:$0xff]  }
   0x2   :  { %289 = vmatpush3.bf16.msra.mxu0 %v331_v0  ;;  %309 = vmatpush3.bf16.msra.mxu1 %v331_v0  ;;  %v56_v4 = vld [vmem:[%s422_s0] sm:$0xff] }
   0x3   :  { %290 = vmatprep.subr.bf16.mxu0 %v363_v1  ;;  %310 = vmatprep.subr.bf16.mxu1 %v363_v1  ;;  %v57_v5 = vld [vmem:[%s423_s1] sm:$0xff] }
   0x4   :  { %304 = vmatprep.mubr.msk.bf16.mxu0 %vm364_vm0, %v363_v1  ;;  %324 = vmatprep.mubr.msk.bf16.mxu1 %vm364_vm0, %v363_v1 }
   0x6   :  { %291 = vmatpush3.bf16.msra.mxu0 %v332_v2  ;;  %311 = vmatpush3.bf16.msra.mxu1 %v332_v2 }
   0x7   :  { %292 = vmatprep.subr.bf16.mxu0 %v363_v1  ;;  %312 = vmatprep.subr.bf16.mxu1 %v363_v1 }
   0x8   :  { %8 = vsyncpa [#allocation4], 0  ;;  %v58_v6 = vsub.f32 %v56_v4, %v57_v5  ;;  %v334_v7 = vld [vmem:[%s424_s2 + $0x20] sm:$0xff]   ;;  %v335_v9 = vld [vmem:[%s424_s2 + $0x18] sm:$0xff]   ;;  %vm54_vm1 = vcmask 253952   ;;  %vm216_vm3 = vcmask 261120  }
   0x9   :  { %v336_v11 = vld [vmem:[%s424_s2 + $0x10] sm:$0xff]   ;;  %v337_v13 = vld [vmem:[%s424_s2 + $0x8] sm:$0xff]   ;;  %v338_v15 = vld [vmem:[%s424_s2] sm:$0xff]   ;;  %55 = vst.msk [vmem:[#allocation2] sm:$0x1] %vm54_vm1, %v363_v1  ;;  %s365_s2 = smov [#allocation3]  }
   0xa   :  { %293 = vmatpush3.bf16.msra.mxu0 %v333_v3  ;;  %313 = vmatpush3.bf16.msra.mxu1 %v333_v3  ;;  %v59_v8 = vmul.f32 %v58_v6, %v58_v6  ;;  %s242_s30 = sshll.u32 %s365_s2, 4  ;;  %vm234_vm5 = vcmask 0   ;;  %s243_s30 = int_to_ptr.vmem [resolvable:$true] %s242_s30 }
   0xb   :  { %294 = vmatprep.subr.bf16.mxu0 %v363_v1  ;;  %314 = vmatprep.subr.bf16.mxu1 %v363_v1  ;;  %s341_s4 = scalar_lea.vmem %s243_s30, 16  ;;  %s345_s5 = scalar_lea.vmem %s243_s30, 32 }
   0xc   :  { %v60_v10 = vpack.c.bf16 %v59_v8, %v59_v8  ;;  %p342_p0 = scmp.ne.s32.totalorder %s243_s30, %s341_s4  ;;  %p346_p1 = scmp.lt.s32.totalorder %s243_s30, %s243_s30 }
   0xd   :  { %p347_p2 = scmp.lt.s32.totalorder %s345_s5, %s341_s4 }
   0xe   :  { %295 = vmatpush3.bf16.msra.mxu0 %v334_v7  ;;  %315 = vmatpush3.bf16.msra.mxu1 %v334_v7  ;;  %v61_v12 = vunpack.c.l.bf16 %v60_v10 }
   0xf   :  { %296 = vmatprep.subr.bf16.mxu0 %v363_v1  ;;  %316 = vmatprep.subr.bf16.mxu1 %v363_v1  ;;  %p348_p3 = por %p347_p2, %p346_p1 }
  0x10   :  { %v62_v14 = vsub.f32 %v59_v8, %v61_v12  ;;  %v208_v37 = vld [vmem:[#allocation2] sm:$0x1] }
  0x11   :  { %p349_p4 = pnand %p348_p3, %p342_p0 }
  0x12   :  { %297 = vmatpush3.bf16.msra.mxu0 %v335_v9  ;;  %317 = vmatpush3.bf16.msra.mxu1 %v335_v9  ;;  %v63_v16 = vpack.c.bf16 %v62_v14, %v62_v14 }
  0x13   :  { %298 = vmatprep.subr.bf16.mxu0 %v363_v1  ;;  %318 = vmatprep.subr.bf16.mxu1 %v363_v1 }
  0x16   :  { %299 = vmatpush3.bf16.msra.mxu0 %v336_v11  ;;  %319 = vmatpush3.bf16.msra.mxu1 %v336_v11 }
  0x17   :  { %300 = vmatprep.subr.bf16.mxu0 %v363_v1  ;;  %320 = vmatprep.subr.bf16.mxu1 %v363_v1 }
  0x1a   :  { %301 = vmatpush3.bf16.msra.mxu0 %v337_v13  ;;  %321 = vmatpush3.bf16.msra.mxu1 %v337_v13 }
  0x1b   :  { %302 = vmatprep.subr.bf16.mxu0 %v363_v1  ;;  %322 = vmatprep.subr.bf16.mxu1 %v363_v1 }
  0x1e   :  { %303 = vmatpush3.bf16.msra.mxu0 %v338_v15  ;;  %323 = vmatpush3.bf16.msra.mxu1 %v338_v15 }
  0x21   :  { %305 = vmatmul.mubr.bf16.vlgmr.msra.gmra.mxu0 %v63_v16  ;;  %325 = vmatmul.mubr.bf16.vlgmr.msra.gmra.mxu1 %v60_v10 }
  0xe1   :  { %v162_v17 = vpop.f32.mrf.mxu0  ;;  %v202_v18 = vpop.f32.mrf.mxu1 }
  0xe2   :  { %v203_v19 = vadd.f32 %v202_v18, %v162_v17 }
  0xe3   :  { %v306_v20 = vpop.f32.mrf.mxu0  ;;  %v326_v21 = vpop.f32.mrf.mxu1 }
  0xe4   :  { %339 = vrsqrt.f32 %v203_v19  ;;  %vm211_vm2 = vcmp.eq.f32.partialorder %v203_v19, inf  ;;  %v214_v28 = vand.u32 2147483648, %v203_v19  ;;  %vm213_vm4 = vcmp.eq.f32.partialorder %v203_v19, 0.0 }
  0xe5   :  { %v165_v22 = vpop.f32.mrf.mxu0  ;;  %v205_v23 = vpop.f32.mrf.mxu1 }
  0xe7   :  { %v307_v24 = vpop.f32.mrf.mxu0  ;;  %v327_v25 = vpop.f32.mrf.mxu1 }
  0xf1   :  { %v340_v26 = vpop.eup %339 }
  0xf2   :  { %v210_v27 = vmul.f32 %v340_v26, %v203_v19 }
  0xf4   :  { %v212_v29 = vsel %vm211_vm2, %v203_v19, %v210_v27 }
  0xf5   :  { %v215_v30 = vsel %vm213_vm4, %v214_v28, %v212_v29 }
  0xf6   :  { %v217_v31 = vsel %vm216_vm3, %v215_v30, 0.0 }
  0xf7   :  { %v218_v32 = vrot.slane %v217_v31, 4 }
  0xf9   :  { %v219_v33 = vadd.f32 %v218_v32, %v217_v31 }
  0xfb   :  { %v220_v34 = vrot.slane %v219_v33, 2 }
  0xfd   :  { %v221_v35 = vadd.f32 %v220_v34, %v219_v33 }
  0xff   :  { %v222_v36 = vrot.slane %v221_v35, 1 }
 0x101   :  { %v223_v38 = vadd.f32 %v222_v36, %v221_v35 }
 0x103   :  { %v224_v39 = vadd.f32 %v223_v38, %v208_v37 }
 0x105   :  { %226 = vst.msk [vmem:[#allocation2] sm:$0x1] %vm54_vm1, %v224_v39 }
 0x10c   :  { %v230_v40 = vld [vmem:[#allocation2] sm:$0x1] }
 0x10d   :  { %v231_v41 = vsel %vm54_vm1, %v230_v40, 0.0 }
 0x10e   :  { %232 = vadd.xlane.f32.xlu0 %v231_v41 }
 0x197   :  { %v233_v42 = vpop.xlane.xlu0 %232 }
 0x198   :  { %235 = vst.msk [vmem:[#allocation3] sm:$0x1] %vm234_vm5, %v233_v42 }
 0x199   :  { %352 = shalt.err (!%p349_p4)
}
 0x19a   :  { %245 = dma.vmem_to_hbm [thread:$0]  %s243_s30, 16, %s425_s3, [#allocation4]  }
 0x19b   :  { %361 = dma.done.wait [#allocation4], 16  }
 0x19c   :  { %362 = vsyncadd [#allocation4], 4294967280 }
 0x19d   :  { %249 = vsyncpa [#allocation4], 1 }

</bundles_post_ra>
